<compile_context>
chip_gen: v6e
topology: v6e:2x2x1
jax: 0.10.0
libtpu: 0.0.40
codegen_flags: <defaults>
</compile_context>

<pallas_src>
import functools

import jax
import jax.numpy as jnp
from jax.experimental import pallas as pl
from jax.experimental.pallas import tpu as pltpu


def top_model_kernel(x_ref, w1_ref, b1_ref, w2_ref, b2_ref, o_ref, *, num_classes):
    # x_ref : (TB, 64)          w1_ref: (64, 64)      b1_ref: (1, 64)
    # w2_ref: (64, Npad=128)    b2_ref: (1, Npad)     o_ref : (TB, num_classes)
    x = x_ref[...]

    # hidden = relu(x @ W1 + b1) -- MXU matmul, f32 accumulate; epilogue on VPU in f32.
    h = jnp.dot(x, w1_ref[...], preferred_element_type=jnp.float32)
    h = jnp.maximum(h + b1_ref[...], 0.0)

    # logits = hidden @ W2 + b2 -- lane-dense (Npad = 128) MXU matmul.
    # Cast h to the weight dtype so an optional bf16 path uses the bf16 MXU;
    # for f32 weights this is a no-op.
    out = jnp.dot(h.astype(w2_ref.dtype), w2_ref[...],
                  preferred_element_type=jnp.float32)
    out = out + b2_ref[...]

    # Narrow store: only the real num_classes columns go back to HBM.
    o_ref[...] = out[:, :num_classes].astype(o_ref.dtype)


def _round_up(n, m):
    return ((n + m - 1) // m) * m


def top_model_forward(x, w1, b1, w2, b2, *, block_b=4096, use_bf16=False,
                      small_batch_fallback=1024):
    """x: (B, input_dim) f32 -> (B, num_classes) f32.

    w1: (input_dim, hidden)   b1: (1, hidden)
    w2: (hidden, num_classes) b2: (1, num_classes)
    """
    B, input_dim = x.shape
    hidden = w1.shape[1]
    num_classes = w2.shape[1]

    # ---- Small-batch fallback: pallas_call fixed overhead dominates. -------
    if B < small_batch_fallback:
        dt = jnp.bfloat16 if use_bf16 else x.dtype
        h = jnp.maximum(
            jnp.dot(x.astype(dt), w1.astype(dt),
                    preferred_element_type=jnp.float32) + b1, 0.0)
        return jnp.dot(h.astype(dt), w2.astype(dt),
                       preferred_element_type=jnp.float32) + b2

    # ---- Lane-dense class dim for the 2nd matmul (weights/bias only). ------
    n_pad = 128 * pl.cdiv(num_classes, 128)            # 11 -> 128
    if n_pad != num_classes:
        w2_p = jnp.pad(w2, ((0, 0), (0, n_pad - num_classes)))
        b2_p = jnp.pad(b2, ((0, 0), (0, n_pad - num_classes)))
    else:
        w2_p, b2_p = w2, b2

    # ---- Batch tiling: even number of tiles when splitting (megacore). -----
    if B <= block_b:
        num_tiles = 1
        tb = _round_up(max(B, 1), 8)
    else:
        num_tiles = pl.cdiv(B, block_b)
        if num_tiles % 2:
            num_tiles += 1                 # even grid -> balanced 2-TC split on v7x
        tb = _round_up(pl.cdiv(B, num_tiles), 8)
    b_pad = num_tiles * tb
    x_in = jnp.pad(x, ((0, b_pad - B), (0, 0))) if b_pad != B else x

    # ---- Optional bf16 feed (halves x read traffic; f32 MXU accumulation). -
    if use_bf16:
        x_in = x_in.astype(jnp.bfloat16)
        w1_in = w1.astype(jnp.bfloat16)
        w2_in = w2_p.astype(jnp.bfloat16)
    else:
        w1_in, w2_in = w1, w2_p

    # Advisory cost hint for the XLA scheduler (narrow output accounted for).
    flops = 2 * b_pad * input_dim * hidden + 2 * b_pad * hidden * n_pad
    bytes_accessed = (
        x_in.size * x_in.dtype.itemsize
        + w1_in.size * w1_in.dtype.itemsize
        + b1.size * b1.dtype.itemsize
        + w2_in.size * w2_in.dtype.itemsize
        + b2_p.size * b2_p.dtype.itemsize
        + b_pad * num_classes * 4)
    cost = pl.CostEstimate(flops=flops, transcendentals=0,
                           bytes_accessed=bytes_accessed)

    kernel = functools.partial(top_model_kernel, num_classes=num_classes)

    out = pl.pallas_call(
        kernel,
        out_shape=jax.ShapeDtypeStruct((b_pad, num_classes), jnp.float32),
        grid=(num_tiles,),
        in_specs=[
            # x: row-tiled along the batch axis (pipelined / double-buffered).
            pl.BlockSpec((tb, input_dim), lambda i: (i, 0)),
            # Weights / biases: constant block index -> resident in VMEM
            # across all grid steps (DMA'd once, not per step).
            pl.BlockSpec((input_dim, hidden), lambda i: (0, 0)),
            pl.BlockSpec((1, hidden), lambda i: (0, 0)),
            pl.BlockSpec((hidden, n_pad), lambda i: (0, 0)),
            pl.BlockSpec((1, n_pad), lambda i: (0, 0)),
        ],
        # Block last dim == full array last dim (num_classes), so <128 is
        # allowed; narrow writeback is what the HBM-bound roofline wants.
        out_specs=pl.BlockSpec((tb, num_classes), lambda i: (i, 0)),
        compiler_params=pltpu.CompilerParams(
            dimension_semantics=("parallel",),
        ),
        cost_estimate=cost,
    )(x_in, w1_in, b1, w2_in, b2_p)

    # Only batch padding is stripped; no column slice needed anymore.
    return out[:B]


def init_params(key, input_dim=64, hidden=64, num_classes=11):
    """Deterministic synthetic init (Kaiming-uniform-like, as in nn.Linear)."""
    k1, k2, k3, k4 = jax.random.split(key, 4)
    bound1 = 1.0 / jnp.sqrt(input_dim)
    bound2 = 1.0 / jnp.sqrt(hidden)
    # Stored as (in, out) so the kernel does x @ W directly.
    w1 = jax.random.uniform(k1, (input_dim, hidden), jnp.float32, -bound1, bound1)
    b1 = jax.random.uniform(k2, (1, hidden), jnp.float32, -bound1, bound1)
    w2 = jax.random.uniform(k3, (hidden, num_classes), jnp.float32, -bound2, bound2)
    b2 = jax.random.uniform(k4, (1, num_classes), jnp.float32, -bound2, bound2)
    return w1, b1, w2, b2


if __name__ == "__main__":
    key = jax.random.PRNGKey(0)
    k_x, k_p = jax.random.split(key)

    B, input_dim, hidden, num_classes = 8, 64, 64, 11
    x = jax.random.normal(k_x, (B, input_dim), jnp.float32)
    w1, b1, w2, b2 = init_params(k_p, input_dim, hidden, num_classes)

    def ref_fn(xx):
        return jnp.maximum(xx @ w1 + b1, 0.0) @ w2 + b2

    # 1) Pallas path, single tile (fallback disabled so the kernel runs).
    out = top_model_forward(x, w1, b1, w2, b2, small_batch_fallback=0)
    out = jax.block_until_ready(out)
    assert out.shape == (B, num_classes)
    assert jnp.allclose(out, ref_fn(x), atol=1e-5, rtol=1e-5)

    # 2) Pallas path, multi-tile grid (even tile count), ragged batch.
    B2 = 37
    x2 = jax.random.normal(jax.random.PRNGKey(7), (B2, input_dim), jnp.float32)
    out2 = jax.block_until_ready(
        top_model_forward(x2, w1, b1, w2, b2, block_b=16, small_batch_fallback=0))
    assert out2.shape == (B2, num_classes)
    assert jnp.allclose(out2, ref_fn(x2), atol=1e-5, rtol=1e-5)

    # 3) Optional bf16 feed (loose tolerance: not f32-exact by design).
    out_bf16 = jax.block_until_ready(
        top_model_forward(x, w1, b1, w2, b2, use_bf16=True, small_batch_fallback=0))
    assert out_bf16.shape == (B, num_classes)
    assert jnp.allclose(out_bf16, ref_fn(x), atol=5e-2, rtol=5e-2)

    # 4) Small-batch jnp fallback path (default threshold).
    out_fb = jax.block_until_ready(top_model_forward(x, w1, b1, w2, b2))
    assert jnp.allclose(out_fb, ref_fn(x), atol=1e-5, rtol=1e-5)

    print("KERNEL_OK")
</pallas_src>

<mosaic_0001>
module attributes {stable_mosaic.version = 11 : i64} {
  func.func @top_model_kernel(%arg0: i32, %arg1: memref<8x64xf32, #tpu.memory_space<vmem>>, %arg2: memref<64x64xf32, #tpu.memory_space<vmem>>, %arg3: memref<1x64xf32, #tpu.memory_space<vmem>>, %arg4: memref<64x128xf32, #tpu.memory_space<vmem>>, %arg5: memref<1x128xf32, #tpu.memory_space<vmem>>, %arg6: memref<8x11xf32, #tpu.memory_space<vmem>>) attributes {dimension_semantics = [#tpu.dimension_semantics<parallel>], iteration_bounds = array<i64: 1>, scalar_prefetch = 0 : i64, scratch_operands = 0 : i64, tpu.core_type = #tpu.core_type<tc>, window_params = [{transform_indices = @transform_0, window_bounds = array<i64: 8, 64>}, {pipeline_mode = #tpu.pipeline_mode<synchronous>, transform_indices = @transform_1, window_bounds = array<i64: 64, 64>}, {pipeline_mode = #tpu.pipeline_mode<synchronous>, transform_indices = @transform_2, window_bounds = array<i64: 1, 64>}, {pipeline_mode = #tpu.pipeline_mode<synchronous>, transform_indices = @transform_3, window_bounds = array<i64: 64, 128>}, {pipeline_mode = #tpu.pipeline_mode<synchronous>, transform_indices = @transform_4, window_bounds = array<i64: 1, 128>}, {transform_indices = @transform_5, window_bounds = array<i64: 8, 11>}]} {
    %c0 = arith.constant 0 : index
    %c0_0 = arith.constant 0 : index
    %0 = vector.load %arg1[%c0, %c0_0] : memref<8x64xf32, #tpu.memory_space<vmem>>, vector<8x64xf32>
    %c0_1 = arith.constant 0 : index
    %c0_2 = arith.constant 0 : index
    %1 = vector.load %arg2[%c0_1, %c0_2] : memref<64x64xf32, #tpu.memory_space<vmem>>, vector<64x64xf32>
    %cst = arith.constant dense<0.000000e+00> : vector<8x64xf32>
    %2 = tpu.matmul %0, %1, %cst {dimension_numbers = #tpu.dot_dimension_numbers<[1], [0], [0], [1], [0, 0, 1, 1], [], []>} : vector<8x64xf32>, vector<64x64xf32>, vector<8x64xf32> -> vector<8x64xf32>
    %c0_3 = arith.constant 0 : index
    %c0_4 = arith.constant 0 : index
    %3 = vector.load %arg3[%c0_3, %c0_4] : memref<1x64xf32, #tpu.memory_space<vmem>>, vector<1x64xf32>
    %4 = vector.broadcast %3 : vector<1x64xf32> to vector<8x64xf32>
    %5 = arith.addf %2, %4 : vector<8x64xf32>
    %cst_5 = arith.constant 0.000000e+00 : f32
    %6 = vector.broadcast %cst_5 : f32 to vector<8x64xf32>
    %7 = arith.maximumf %5, %6 : vector<8x64xf32>
    %c0_6 = arith.constant 0 : index
    %c0_7 = arith.constant 0 : index
    %8 = vector.load %arg4[%c0_6, %c0_7] : memref<64x128xf32, #tpu.memory_space<vmem>>, vector<64x128xf32>
    %cst_8 = arith.constant dense<0.000000e+00> : vector<8x128xf32>
    %9 = tpu.matmul %7, %8, %cst_8 {dimension_numbers = #tpu.dot_dimension_numbers<[1], [0], [0], [1], [0, 0, 1, 1], [], []>} : vector<8x64xf32>, vector<64x128xf32>, vector<8x128xf32> -> vector<8x128xf32>
    %c0_9 = arith.constant 0 : index
    %c0_10 = arith.constant 0 : index
    %10 = vector.load %arg5[%c0_9, %c0_10] : memref<1x128xf32, #tpu.memory_space<vmem>>, vector<1x128xf32>
    %11 = vector.broadcast %10 : vector<1x128xf32> to vector<8x128xf32>
    %12 = arith.addf %9, %11 : vector<8x128xf32>
    %13 = vector.extract_strided_slice %12 {offsets = [0, 0], sizes = [8, 11], strides = [1, 1]} : vector<8x128xf32> to vector<8x11xf32>
    %c0_11 = arith.constant 0 : index
    %c0_12 = arith.constant 0 : index
    %14 = vector.load %arg6[%c0_11, %c0_12] : memref<8x11xf32, #tpu.memory_space<vmem>>, vector<8x11xf32>
    tpu.vector_store %arg6[%c0_11, %c0_12], %13 {strides = array<i32>} : memref<8x11xf32, #tpu.memory_space<vmem>>, vector<8x11xf32>,
    return
  }
  func.func @transform_0(%arg0: i32) -> (i32, i32) {
    %c0_i32 = arith.constant 0 : i32
    %c0_i32_0 = arith.constant 0 : i32
    return %arg0, %c0_i32 : i32, i32
  }
  func.func @transform_1(%arg0: i32) -> (i32, i32) {
    %c0_i32 = arith.constant 0 : i32
    %c0_i32_0 = arith.constant 0 : i32
    %c0_i32_1 = arith.constant 0 : i32
    return %c0_i32, %c0_i32_0 : i32, i32
  }
  func.func @transform_2(%arg0: i32) -> (i32, i32) {
    %c0_i32 = arith.constant 0 : i32
    %c0_i32_0 = arith.constant 0 : i32
    %c0_i32_1 = arith.constant 0 : i32
    return %c0_i32, %c0_i32_0 : i32, i32
  }
  func.func @transform_3(%arg0: i32) -> (i32, i32) {
    %c0_i32 = arith.constant 0 : i32
    %c0_i32_0 = arith.constant 0 : i32
    %c0_i32_1 = arith.constant 0 : i32
    return %c0_i32, %c0_i32_0 : i32, i32
  }
  func.func @transform_4(%arg0: i32) -> (i32, i32) {
    %c0_i32 = arith.constant 0 : i32
    %c0_i32_0 = arith.constant 0 : i32
    %c0_i32_1 = arith.constant 0 : i32
    return %c0_i32, %c0_i32_0 : i32, i32
  }
  func.func @transform_5(%arg0: i32) -> (i32, i32) {
    %c0_i32 = arith.constant 0 : i32
    %c0_i32_0 = arith.constant 0 : i32
    return %arg0, %c0_i32 : i32, i32
  }
}

</mosaic_0001>

<bundles_post_ra>
// kernel: tpu_custom_call.1
= control target key start
LH: loop header
LB: loop body
LE: loop exit
PB: predicated region body
PF: predicated region fallthrough
CT: control target
= control target key end

     0   :  { %10 = vsyncpa [#allocation3], 0  ;;  %s469_s0 = inlined_call_operand.hbm [shape: f32[8,64], index: 0, kind: input, shape index: {}]   ;;  %s470_s1 = inlined_call_operand.hbm [shape: f32[64,64], index: 1, kind: input, shape index: {}]   ;;  %s471_s2 = inlined_call_operand.vmem [shape: f32[1,64], index: 2, kind: input, shape index: {}]   ;;  %s472_s3 = inlined_call_operand.hbm [shape: f32[64,128], index: 3, kind: input, shape index: {}]   ;;  %s473_s4 = inlined_call_operand.vmem [shape: f32[1,128], index: 4, kind: input, shape index: {}]   ;;  %s474_s5 = inlined_call_operand.hbm [shape: f32[8,11], index: 5, kind: output, shape index: {}]  }
   0x1   :  { %11 = vsyncpa [#allocation6], 0 }
   0x2   :  { %12 = vsyncpa [#allocation4], 0  ;;  %s411_s18 = smov [#allocation5]  }
   0x3   :  { %s28_s19 = sshll.u32 %s411_s18, 4  ;;  %s29_s19 = int_to_ptr.vmem [resolvable:$true] %s28_s19 }
   0x4   :  { %s333_s20 = scalar_lea.vmem %s29_s19, 1024  ;;  %p338_p1 = scmp.lt.s32.totalorder %s29_s19, %s29_s19 }
   0x5   :  { %p334_p0 = scmp.ne.s32.totalorder %s29_s19, %s333_s20  ;;  %p339_p2 = scmp.lt.s32.totalorder %s333_s20, %s333_s20 }
   0x7   :  { %p340_p3 = por %p339_p2, %p338_p1 }
   0x9   :  { %p341_p4 = pnand %p340_p3, %p334_p0 }
   0xb   :  { %344 = shalt.err (!%p341_p4)
}
   0xc   :  { %s412_s21 = smov 128   ;;  %s413_s22 = smov 8  }
   0xd   :  { %34 = dma.hbm_to_vmem [thread:$0]  %s470_s1, 1024, %s29_s19, [#allocation6], %s412_s21, %s412_s21, %s413_s22  }
   0xe   :  { %s414_s25 = smov [#allocation2]   ;;  %s415_s27 = smov [#allocation7]  }
   0xf   :  { %s19_s26 = sshll.u32 %s414_s25, 4  ;;  %s42_s28 = sshll.u32 %s415_s27, 4  ;;  %s20_s26 = int_to_ptr.vmem [resolvable:$true] %s19_s26  ;;  %s43_s28 = int_to_ptr.vmem [resolvable:$true] %s42_s28 }
  0x10   :  { %s353_s29 = scalar_lea.vmem %s20_s26, 128  ;;  %p358_p6 = scmp.lt.s32.totalorder %s20_s26, %s20_s26 }
  0x11   :  { %p354_p5 = scmp.ne.s32.totalorder %s20_s26, %s353_s29  ;;  %p359_p7 = scmp.lt.s32.totalorder %s353_s29, %s353_s29 }
  0x13   :  { %p360_p8 = por %p359_p7, %p358_p6 }
  0x15   :  { %p361_p9 = pnand %p360_p8, %p354_p5 }
  0x17   :  { %364 = shalt.err (!%p361_p9)
}
  0x18   :  { %22 = dma.hbm_to_vmem [thread:$0]  %s469_s0, 128, %s20_s26, [#allocation3]  }
  0x19   :  { %s373_s7 = scalar_lea.vmem %s43_s28, 1024  ;;  %p378_p11 = scmp.lt.s32.totalorder %s43_s28, %s43_s28 }
  0x1a   :  { %p374_p10 = scmp.ne.s32.totalorder %s43_s28, %s373_s7  ;;  %p379_p12 = scmp.lt.s32.totalorder %s373_s7, %s373_s7 }
  0x1c   :  { %p380_p13 = por %p379_p12, %p378_p11 }
  0x1e   :  { %p381_p0 = pnand %p380_p13, %p374_p10 }
  0x20   :  { %384 = shalt.err (!%p381_p0)
}
  0x21   :  { %48 = dma.hbm_to_vmem [thread:$0]  %s472_s3, 1024, %s43_s28, [#allocation6], %s412_s21, %s412_s21, %s413_s22  }
  0x22   :  { %405 = dma.done.wait [#allocation3], 128  }
  0x23   :  { %406 = vsyncadd [#allocation3], 4294967168 }
  0x24   :  { %407 = dma.done.wait [#allocation6], 2048  }
  0x25   :  { %408 = vsyncadd [#allocation6], 4294965248  ;;  %v416_v0 = vmov 0.0   ;;  %vm417_vm0 = vmmov 0   ;;  %v68_v1 = vld [vmem:[#allocation5 + $0x38] sm:$0xff]  ;;  %v67_v2 = vld [vmem:[#allocation5 + $0x30] sm:$0xff] }
  0x26   :  { %279 = vmatprep.subr.mxu0 %v416_v0  ;;  %295 = vmatprep.mubr.msk.f32.mxu0 %vm417_vm0, %v416_v0  ;;  %v66_v3 = vld [vmem:[#allocation5 + $0x28] sm:$0xff]  ;;  %v158_v4 = vld [vmem:[#allocation7 + $0x38] sm:$0xff]  ;;  %v157_v5 = vld [vmem:[#allocation7 + $0x30] sm:$0xff]  ;;  %vm76_vm1 = vcmask 523264   ;;  %s418_s11 = smov [#allocation8]   ;;  %vm239_vm2 = vcmask 89088  }
  0x27   :  { %298 = vmatprep.subr.mxu1 %v416_v0  ;;  %314 = vmatprep.mubr.msk.f32.mxu1 %vm417_vm0, %v416_v0  ;;  %v65_v6 = vld [vmem:[#allocation5 + $0x20] sm:$0xff]  ;;  %v156_v7 = vld [vmem:[#allocation7 + $0x28] sm:$0xff]  ;;  %v64_v8 = vld [vmem:[#allocation5 + $0x18] sm:$0xff]  ;;  %s247_s12 = sshll.u32 %s418_s11, 4  ;;  %s248_s12 = int_to_ptr.vmem [resolvable:$true] %s247_s12 }
  0x28   :  { %280 = vmatpush3.msra.mxu0 %v68_v1  ;;  %299 = vmatpush3.msra.mxu1 %v158_v4  ;;  %v155_v9 = vld [vmem:[#allocation7 + $0x20] sm:$0xff]  ;;  %v63_v10 = vld [vmem:[#allocation5 + $0x10] sm:$0xff]  ;;  %v154_v11 = vld [vmem:[#allocation7 + $0x18] sm:$0xff]  ;;  %s385_s13 = scalar_lea.vmem %s248_s12, 128  ;;  %p390_p2 = scmp.lt.s32.totalorder %s248_s12, %s248_s12 }
  0x29   :  { %281 = vmatprep.subr.mxu0 %v416_v0  ;;  %300 = vmatprep.subr.mxu1 %v416_v0  ;;  %v62_v12 = vld [vmem:[#allocation5 + $0x8] sm:$0xff]  ;;  %v61_v13 = vld [vmem:[#allocation5] sm:$0xff]  ;;  %v60_v14 = vld [vmem:[#allocation2] sm:$0xff]  ;;  %p386_p1 = scmp.ne.s32.totalorder %s248_s12, %s385_s13  ;;  %p391_p3 = scmp.lt.s32.totalorder %s385_s13, %s385_s13 }
  0x2a   :  { %282 = vmatpush3.msra.mxu0 %v67_v2  ;;  %301 = vmatpush3.msra.mxu1 %v157_v5  ;;  %v153_v15 = vld [vmem:[#allocation7 + $0x10] sm:$0xff]  ;;  %v152_v16 = vld [vmem:[#allocation7 + $0x8] sm:$0xff]  ;;  %v151_v17 = vld [vmem:[#allocation7] sm:$0xff] }
  0x2b   :  { %283 = vmatprep.subr.mxu0 %v416_v0  ;;  %302 = vmatprep.subr.mxu1 %v416_v0  ;;  %v257_v18 = vld [vmem:[%s471_s2] ss:$0 sm:$0xff]  ;;  %p392_p4 = por %p391_p3, %p390_p2 }
  0x2c   :  { %284 = vmatpush3.msra.mxu0 %v66_v3  ;;  %303 = vmatpush3.msra.mxu1 %v156_v7  ;;  %v259_v23 = vld [vmem:[%s473_s4] ss:$0 sm:$0xff] }
  0x2d   :  { %285 = vmatprep.subr.mxu0 %v416_v0  ;;  %304 = vmatprep.subr.mxu1 %v416_v0  ;;  %p393_p5 = pnand %p392_p4, %p386_p1 }
  0x2e   :  { %286 = vmatpush3.msra.mxu0 %v65_v6  ;;  %305 = vmatpush3.msra.mxu1 %v155_v9 }
  0x2f   :  { %287 = vmatprep.subr.mxu0 %v416_v0  ;;  %306 = vmatprep.subr.mxu1 %v416_v0 }
  0x30   :  { %288 = vmatpush3.msra.mxu0 %v64_v8  ;;  %307 = vmatpush3.msra.mxu1 %v154_v11 }
  0x31   :  { %289 = vmatprep.subr.mxu0 %v416_v0  ;;  %308 = vmatprep.subr.mxu1 %v416_v0 }
  0x32   :  { %290 = vmatpush3.msra.mxu0 %v63_v10  ;;  %309 = vmatpush3.msra.mxu1 %v153_v15 }
  0x33   :  { %291 = vmatprep.subr.mxu0 %v416_v0  ;;  %310 = vmatprep.subr.mxu1 %v416_v0 }
  0x34   :  { %292 = vmatpush3.msra.mxu0 %v62_v12  ;;  %311 = vmatpush3.msra.mxu1 %v152_v16 }
  0x35   :  { %293 = vmatprep.subr.mxu0 %v416_v0  ;;  %312 = vmatprep.subr.mxu1 %v416_v0 }
  0x36   :  { %294 = vmatpush3.msra.mxu0 %v61_v13  ;;  %313 = vmatpush3.msra.mxu1 %v151_v17 }
  0x37   :  { %296 = vmatmul.mubr.msk.f32.vlgmr.msra.gmra.mxu0 %vm76_vm1, %v60_v14 }
  0xf7   :  { %v146_v19 = vpop.f32.mrf.mxu0 }
  0xf8   :  { %v147_v20 = vadd.f32 %v257_v18, %v146_v19 }
  0xf9   :  { %v297_v21 = vpop.f32.mrf.mxu0 }
  0xfa   :  { %v150_v22 = vmax.f32 %v147_v20, 0.0 }
  0xfc   :  { %315 = vmatmul.mubr.msk.f32.vlgmr.msra.gmra.mxu1 %vm76_vm1, %v150_v22 }
 0x1bc   :  { %v235_v24 = vpop.f32.mrf.mxu1 }
 0x1bd   :  { %v236_v25 = vadd.f32 %v259_v23, %v235_v24 }
 0x1be   :  { %v316_v26 = vpop.f32.mrf.mxu1 }
 0x1bf   :  { %240 = vst.msk [vmem:[#allocation8] sm:$0xff] %vm239_vm2, %v236_v25 }
 0x1c0   :  { %396 = shalt.err (!%p393_p5)
}
 0x1c1   :  { %250 = dma.vmem_to_hbm [thread:$0]  %s248_s12, 128, %s474_s5, [#allocation4]  }
 0x1c2   :  { %409 = dma.done.wait [#allocation4], 128  }
 0x1c3   :  { %410 = vsyncadd [#allocation4], 4294967168 }
 0x1c4   :  { %254 = vsyncpa [#allocation3], 1 }
 0x1c5   :  { %255 = vsyncpa [#allocation6], 1 }
 0x1c6   :  { %256 = vsyncpa [#allocation4], 1 }

</bundles_post_ra>
